<compile_context>
chip_gen: v7x
topology: tpu7x:2x2x1
jax: 0.10.0
libtpu: 0.0.40
codegen_flags: <defaults>
</compile_context>

<pallas_src>
import jax
import jax.numpy as jnp
from jax.experimental import pallas as pl
from jax.experimental.pallas import tpu as pltpu


_LANE_CANDIDATES = (512, 256, 128)   # lane widths tried for the dense 2-D view
_TARGET_OUT_BYTES = 4 << 20          # ~4 MiB of f32 output per grid step


def _make_scale_kernel(div):
    # Python float literal -> baked into the jaxpr as an immediate, NOT a
    # captured constant (fixes the previous trace error). Multiply by the
    # reciprocal instead of dividing (<=1 ulp vs torchvision's true divide).
    inv = 1.0 / float(div)

    def kernel(x_ref, o_ref):
        o_ref[...] = x_ref[...].astype(jnp.float32) * inv

    return kernel


def _choose_lanes(total):
    """Largest lane width (multiple of 128) that divides `total`; else pad."""
    for lanes in _LANE_CANDIDATES:
        if total % lanes == 0:
            return lanes, 0
    lanes = 128
    pad = (-total) % lanes
    # TODO(synk): the pad path adds one extra HBM read+write of the flat u8
    # buffer; typical image sizes (H*W*3) divide 512/256/128 and avoid it.
    return lanes, pad


def _pick_block_rows(rows, lanes):
    """Rows per grid step: big enough to hide per-step overhead, small enough
    for double-buffered VMEM on all of v5e/v6e/v7x, and >=2 steps if possible."""
    br = max(8, _TARGET_OUT_BYTES // (lanes * 4))
    if rows < 16:
        return rows                                  # tiny: one full-extent block
    br = min(br, max(8, (rows // 2) // 8 * 8))       # guarantee >= 2 grid steps
    if br >= 32:
        br = (br // 32) * 32                         # 32-row align for the u8 input
    else:
        br = max(8, (br // 8) * 8)                   # (8,128) rule for f32 output
    return br


def pil_to_tensor(image, div=None):
    """torchvision PILToTensor forward.

    image: uint8 RGB array, (H, W, 3) or batched (N, H, W, 3).
    Returns (3, H, W) / (N, 3, H, W); float32 if `div` is truthy, else uint8.
    """
    # TODO(synk): PIL Image.convert(mode='RGB') (palette / gray / RGBA -> RGB)
    # has no array-level equivalent here; input must already be 3-channel RGB u8.
    assert image.dtype == jnp.uint8 and image.shape[-1] == 3
    batched = image.ndim == 4
    if not batched:
        image = image[None]  # (1, H, W, 3)
    N, H, W, C = image.shape

    # HWC -> CHW: layout plumbing on uint8 (cheapest dtype to relayout).
    chw = jnp.transpose(image, (0, 3, 1, 2))  # (N, 3, H, W)

    if not div:  # matches `if self.div:` (None / 0 -> no scaling)
        out = chw  # no compute -> no kernel launch, no extra HBM copy
        return out if batched else out[0]

    # Dense 2-D view of the flattened CHW buffer: (rows, lanes) with lanes a
    # multiple of 128 and block rows a multiple of 8/32 -> full vreg occupancy,
    # contiguous DMA, unmasked stores (except at most the final edge block).
    total = N * C * H * W
    lanes, pad = _choose_lanes(total)
    flat = chw.reshape(-1)
    if pad:
        flat = jnp.pad(flat, (0, pad))
    rows = (total + pad) // lanes
    flat2d = flat.reshape(rows, lanes)

    block_rows = _pick_block_rows(rows, lanes)
    num_blocks = pl.cdiv(rows, block_rows)

    out2d = pl.pallas_call(
        _make_scale_kernel(div),
        out_shape=jax.ShapeDtypeStruct((rows, lanes), jnp.float32),
        grid_spec=pltpu.PrefetchScalarGridSpec(
            num_scalar_prefetch=0,
            grid=(num_blocks,),
            in_specs=[pl.BlockSpec((block_rows, lanes), lambda i: (i, 0))],
            out_specs=pl.BlockSpec((block_rows, lanes), lambda i: (i, 0)),
        ),
        compiler_params=pltpu.CompilerParams(
            dimension_semantics=("parallel",),
        ),
        # Bandwidth-heavy, ~zero flops: help XLA overlap surrounding HLO.
        cost_estimate=pl.CostEstimate(
            flops=total, transcendentals=0, bytes_accessed=5 * total),
    )(flat2d)

    out_flat = out2d.reshape(-1)
    if pad:
        out_flat = out_flat[:total]
    out = out_flat.reshape(N, C, H, W)
    return out if batched else out[0]


if __name__ == "__main__":
    key = jax.random.PRNGKey(0)
    k0, k1, k2 = jax.random.split(key, 3)
    div = 255.0

    # --- path 1: single small image (lanes=128, single full-extent block) ---
    H, W = 16, 24
    image = jax.random.randint(k0, (H, W, 3), 0, 256, dtype=jnp.int32).astype(jnp.uint8)
    out = jax.block_until_ready(pil_to_tensor(image, div=div))
    ref = jnp.transpose(image, (2, 0, 1)).astype(jnp.float32) / div
    assert out.shape == (3, H, W) and out.dtype == jnp.float32
    assert jnp.allclose(out, ref, atol=1e-6), "float path mismatch"

    # --- path 2: batched input -> dense (24, 512) view, 3 grid steps ---
    Nb, Hb, Wb = 2, 32, 64
    batch = jax.random.randint(k1, (Nb, Hb, Wb, 3), 0, 256, dtype=jnp.int32).astype(jnp.uint8)
    out_b = jax.block_until_ready(pil_to_tensor(batch, div=div))
    ref_b = jnp.transpose(batch, (0, 3, 1, 2)).astype(jnp.float32) / div
    assert out_b.shape == (Nb, 3, Hb, Wb) and out_b.dtype == jnp.float32
    assert jnp.allclose(out_b, ref_b, atol=1e-6), "batched float path mismatch"

    # --- path 3: div = None (uint8, pure pil_to_tensor -> no kernel launched) ---
    out_u8 = jax.block_until_ready(pil_to_tensor(image, div=None))
    ref_u8 = jnp.transpose(image, (2, 0, 1))
    assert out_u8.shape == (3, H, W) and out_u8.dtype == jnp.uint8
    assert bool(jnp.all(out_u8 == ref_u8)), "uint8 path mismatch"

    # --- path 4: ragged total (105 elements -> internal pad to lane multiple) ---
    Hr, Wr = 5, 7
    image_r = jax.random.randint(k2, (Hr, Wr, 3), 0, 256, dtype=jnp.int32).astype(jnp.uint8)
    out_r = jax.block_until_ready(pil_to_tensor(image_r, div=div))
    ref_r = jnp.transpose(image_r, (2, 0, 1)).astype(jnp.float32) / div
    assert out_r.shape == (3, Hr, Wr) and out_r.dtype == jnp.float32
    assert jnp.allclose(out_r, ref_r, atol=1e-6), "ragged path mismatch"

    print("KERNEL_OK")
</pallas_src>

<mosaic_0001>
module attributes {stable_mosaic.version = 11 : i64} {
  func.func @kernel(%arg0: i32, %arg1: memref<9x128xi8, #tpu.memory_space<vmem>>, %arg2: memref<9x128xf32, #tpu.memory_space<vmem>>) attributes {dimension_semantics = [#tpu.dimension_semantics<parallel>], iteration_bounds = array<i64: 1>, scalar_prefetch = 0 : i64, scratch_operands = 0 : i64, tpu.core_type = #tpu.core_type<tc>, window_params = [{transform_indices = @transform_0, window_bounds = array<i64: 9, 128>}, {transform_indices = @transform_1, window_bounds = array<i64: 9, 128>}]} {
    %c0 = arith.constant 0 : index
    %c0_0 = arith.constant 0 : index
    %0 = vector.load %arg1[%c0, %c0_0] : memref<9x128xi8, #tpu.memory_space<vmem>>, vector<9x128xi8>
    %1 = arith.uitofp %0 : vector<9x128xi8> to vector<9x128xf32>
    %cst = arith.constant 0.00392156886 : f32
    %2 = vector.broadcast %cst : f32 to vector<9x128xf32>
    %3 = arith.mulf %1, %2 : vector<9x128xf32>
    %c0_1 = arith.constant 0 : index
    %c0_2 = arith.constant 0 : index
    %4 = vector.load %arg2[%c0_1, %c0_2] : memref<9x128xf32, #tpu.memory_space<vmem>>, vector<9x128xf32>
    tpu.vector_store %arg2[%c0_1, %c0_2], %3 {strides = array<i32>} : memref<9x128xf32, #tpu.memory_space<vmem>>, vector<9x128xf32>,
    return
  }
  func.func @transform_0(%arg0: i32) -> (i32, i32) {
    %c0_i32 = arith.constant 0 : i32
    %c0_i32_0 = arith.constant 0 : i32
    return %arg0, %c0_i32 : i32, i32
  }
  func.func @transform_1(%arg0: i32) -> (i32, i32) {
    %c0_i32 = arith.constant 0 : i32
    %c0_i32_0 = arith.constant 0 : i32
    return %arg0, %c0_i32 : i32, i32
  }
}

</mosaic_0001>

<bundles_post_ra>
// kernel: tpu_custom_call.1
= control target key start
LH: loop header
LB: loop body
LE: loop exit
PB: predicated region body
PF: predicated region fallthrough
CT: control target
= control target key end

     0   :  { %6 = vsyncpa [#allocation3], 0  ;;  %s146_s0 = inlined_call_operand.hbm [shape: u8[9,128], index: 0, kind: input, shape index: {}]   ;;  %s147_s1 = inlined_call_operand.hbm [shape: f32[9,128], index: 1, kind: output, shape index: {}]  }
   0x1   :  { %7 = vsyncpa [#allocation4], 0  ;;  %s106_s6 = smov [#allocation2]   ;;  %s58_s10 = scalar_lea.hbm %s146_s0, 64 }
   0x2   :  { %s13_s7 = sshll.u32 %s106_s6, 4  ;;  %p59_p0 = scmp.ne.s32.totalorder %s146_s0, %s58_s10  ;;  %s14_s7 = int_to_ptr.vmem [resolvable:$true] %s13_s7 }
   0x3   :  { %p62_p1 = scmp.lt.u32.totalorder %s58_s10, %s146_s0 }
   0x5   :  { %p64_p2 = pnand %p62_p1, %p59_p0 }
   0x7   :  { %67 = shalt.err (!%p64_p2)
}
   0x8   :  { %s68_s15 = scalar_lea.vmem %s14_s7, 64  ;;  %p73_p4 = scmp.lt.s32.totalorder %s14_s7, %s14_s7 }
   0x9   :  { %p69_p3 = scmp.ne.s32.totalorder %s14_s7, %s68_s15  ;;  %p74_p5 = scmp.lt.s32.totalorder %s68_s15, %s68_s15 }
   0xb   :  { %p75_p6 = por %p74_p5, %p73_p4 }
   0xd   :  { %p76_p7 = pnand %p75_p6, %p69_p3 }
   0xf   :  { %79 = shalt.err (!%p76_p7)
}
  0x10   :  { %s107_s16 = smov 32   ;;  %s108_s17 = smov 2  }
  0x11   :  { %19 = dma.hbm_to_vmem [thread:$0]  %s146_s0, 64, %s14_s7, [#allocation3], %s107_s16, %s107_s16, %s108_s17  }
  0x12   :  { %102 = dma.done.wait [#allocation3], 64  }
  0x13   :  { %103 = vsyncadd [#allocation3], 4294967232  ;;  %v23_v0 = vld [vmem:[#allocation2] sm:$0x3]  ;;  %v24_v1 = vld [vmem:[#allocation2 + $0x2] sm:$0x1] }
  0x14   :  { %v25_v2 = vunpack.c.0.s8 %v23_v0  ;;  %v26_v3 = vunpack.c.0.s8 %v24_v1  ;;  %s109_s20 = smov [#allocation5]  }
  0x15   :  { %s40_s21 = sshll.u32 %s109_s20, 4  ;;  %s41_s21 = int_to_ptr.vmem [resolvable:$true] %s40_s21 }
  0x16   :  { %v27_v4 = vand.u32 255, %v25_v2  ;;  %v28_v5 = vand.u32 255, %v26_v3  ;;  %s80_s22 = scalar_lea.vmem %s41_s21, 256  ;;  %p85_p9 = scmp.lt.s32.totalorder %s41_s21, %s41_s21 }
  0x17   :  { %p81_p8 = scmp.ne.s32.totalorder %s41_s21, %s80_s22  ;;  %p86_p10 = scmp.lt.s32.totalorder %s80_s22, %s80_s22 }
  0x18   :  { %v29_v6 = vcvt.s32.f32 %v27_v4  ;;  %v30_v7 = vcvt.s32.f32 %v28_v5 }
  0x19   :  { %p87_p11 = por %p86_p10, %p85_p9 }
  0x1a   :  { %v31_v8 = vmul.f32 0.003921569, %v29_v6  ;;  %v32_v9 = vmul.f32 0.003921569, %v30_v7 }
  0x1b   :  { %p88_p12 = pnand %p87_p11, %p81_p8 }
  0x1c   :  { %33 = vst [vmem:[#allocation5] sm:$0xff] %v31_v8  ;;  %34 = vst [vmem:[#allocation5 + $0x8] sm:$0x1] %v32_v9 }
  0x1d   :  { %91 = shalt.err (!%p88_p12)
}
  0x1e   :  { %s92_s24 = scalar_lea.hbm %s147_s1, 256 }
  0x1f   :  { %p93_p13 = scmp.ne.s32.totalorder %s147_s1, %s92_s24  ;;  %p96_p0 = scmp.lt.u32.totalorder %s92_s24, %s147_s1 }
  0x21   :  { %p98_p1 = pnand %p96_p0, %p93_p13 }
  0x23   :  { %101 = shalt.err (!%p98_p1)
}
  0x24   :  { %s110_s29 = smov 128   ;;  %s111_s30 = smov 8  }
  0x25   :  { %46 = dma.vmem_to_hbm [thread:$0]  %s41_s21, 256, %s147_s1, [#allocation4], %s110_s29, %s110_s29, %s111_s30  }
  0x26   :  { %104 = dma.done.wait [#allocation4], 256  }
  0x27   :  { %105 = vsyncadd [#allocation4], 4294967040 }
  0x28   :  { %50 = vsyncpa [#allocation3], 1 }
  0x29   :  { %51 = vsyncpa [#allocation4], 1 }

</bundles_post_ra>
